<compile_context>
chip_gen: v5e
topology: v5e:2x2
jax: 0.10.0
libtpu: 0.0.40
codegen_flags: <defaults>
</compile_context>

<pallas_src>
import functools

import jax
import jax.numpy as jnp
from jax import lax
from jax.experimental import pallas as pl
from jax.experimental.pallas import tpu as pltpu


def _resnet_block_kernel(H, W,
                         x_ref, hc_ref, wc_ref,
                         w0_ref, b0_ref, w1_ref, b1_ref, ws_ref,
                         out_ref, col0, col1):
    """One image per grid step.

    x_ref : (1, Cin, HW)   activations, HW = H*W (lane dim, multiple of 128)
    hc_ref: (1, HW) int32  h coordinate of each flattened pixel
    wc_ref: (1, HW) int32  w coordinate of each flattened pixel
    w0_ref: (Ch, 9*Cin)    conv_0 weight, packed [tap-major, in-channel-minor]
    b0_ref: (Ch, 1)        conv_0 bias
    w1_ref: (Cout, 9*Ch)   conv_1 weight, same packing
    b1_ref: (Cout, 1)      conv_1 bias
    ws_ref: (Cout, Cin)    1x1 shortcut weight (identity when fin == fout)
    out_ref: (1, Cout, HW)
    col0  : (9*Cin, HW) VMEM scratch — im2col stack for conv_0
    col1  : (9*Ch,  HW) VMEM scratch — im2col stack for conv_1
    """
    HW = H * W
    hc = hc_ref[...]                                   # (1, HW) int32
    wc = wc_ref[...]                                   # (1, HW) int32

    def build_im2col(a, col_ref):
        # a: (C, HW), already ReLU'd.  Writes the 9 shifted+masked taps so that
        #   col_ref[t*C + ci, p] = a[ci, p + di*W + dj]   (0 outside the image)
        # with t = (di+1)*3 + (dj+1); matches the (O, 9*I) weight packing.
        C = a.shape[0]
        for di in (-1, 0, 1):
            for dj in (-1, 0, 1):
                t = (di + 1) * 3 + (dj + 1)
                s = di * W + dj
                # roll along the lane axis (XLU) so position p sees a[p + s]
                shifted = a if s == 0 else pltpu.roll(a, shift=(-s) % HW, axis=1)
                mask = None
                if di == -1:
                    mask = hc >= 1
                elif di == 1:
                    mask = hc <= H - 2
                if dj == -1:
                    mask = (wc >= 1) if mask is None else (mask & (wc >= 1))
                elif dj == 1:
                    mask = (wc <= W - 2) if mask is None else (mask & (wc <= W - 2))
                tap = shifted if mask is None else jnp.where(mask, shifted, 0.0)
                col_ref[t * C:(t + 1) * C, :] = tap

    x = x_ref[0]                                                          # (Cin, HW)

    # --- shortcut: 1x1 conv (identity matrix passed when fin == fout) ---
    x_s = jnp.dot(ws_ref[...], x, preferred_element_type=jnp.float32)     # (Cout, HW)

    # --- dx = conv_0(relu(x)) : single K = 9*Cin matmul, lane-dense result ---
    build_im2col(jnp.maximum(x, 0.0), col0)
    h = jnp.dot(w0_ref[...], col0[...],
                preferred_element_type=jnp.float32) + b0_ref[...]         # (Ch, HW)

    # --- dx = conv_1(relu(dx)) : single K = 9*Ch matmul ---
    build_im2col(jnp.maximum(h, 0.0), col1)
    dx = jnp.dot(w1_ref[...], col1[...],
                 preferred_element_type=jnp.float32) + b1_ref[...]        # (Cout, HW)

    # --- out = x_s + dx : full-width (Cout, HW) lane-dense store ---
    out_ref[0] = x_s + dx


def resnet_block_forward(x_nchw, w0_oihw, b0, w1_oihw, b1, ws_oihw=None):
    """Fused ResnetBlock forward.

    x_nchw : (N, fin, H, W) float32                (PyTorch NCHW layout)
    w0_oihw: (fhidden, fin, 3, 3), b0: (fhidden,)  conv_0
    w1_oihw: (fout, fhidden, 3, 3), b1: (fout,)    conv_1
    ws_oihw: (fout, fin, 1, 1) or None             conv_s (None => identity,
                                                    requires fin == fout)
    Returns (N, fout, H, W) float32.
    """
    N, Cin, H, W = x_nchw.shape
    Ch = int(w0_oihw.shape[0])
    Cout = int(w1_oihw.shape[0])
    HW = H * W
    assert HW % 128 == 0, "H*W must be a multiple of 128 for lane-dense tiles"

    # Free, contiguous reshape (no NCHW<->NHWC transpose passes over HBM).
    x3 = x_nchw.reshape(N, Cin, HW).astype(jnp.float32)

    # Pack conv weights OIHW -> (O, 9*I), tap-major / in-channel-minor, matching
    # the kernel's im2col row order.
    w0p = jnp.transpose(w0_oihw, (0, 2, 3, 1)).reshape(Ch, 9 * Cin).astype(jnp.float32)
    w1p = jnp.transpose(w1_oihw, (0, 2, 3, 1)).reshape(Cout, 9 * Ch).astype(jnp.float32)
    if ws_oihw is None:
        assert Cin == Cout, "identity shortcut requires fin == fout"
        ws2 = jnp.eye(Cout, dtype=jnp.float32)
    else:
        ws2 = ws_oihw[:, :, 0, 0].astype(jnp.float32)          # (Cout, Cin)
    b0c = b0.reshape(Ch, 1).astype(jnp.float32)
    b1c = b1.reshape(Cout, 1).astype(jnp.float32)

    # Flattened-pixel coordinates (precomputed so the kernel never does int //,%).
    pix = jnp.arange(HW, dtype=jnp.int32)
    hcoord = (pix // W).reshape(1, HW)
    wcoord = (pix % W).reshape(1, HW)

    kernel = functools.partial(_resnet_block_kernel, H, W)

    out3 = pl.pallas_call(
        kernel,
        out_shape=jax.ShapeDtypeStruct((N, Cout, HW), jnp.float32),
        grid_spec=pltpu.PrefetchScalarGridSpec(
            num_scalar_prefetch=0,
            grid=(N,),
            in_specs=[
                pl.BlockSpec((1, Cin, HW), lambda n: (n, 0, 0)),
                pl.BlockSpec((1, HW), lambda n: (0, 0)),
                pl.BlockSpec((1, HW), lambda n: (0, 0)),
                pl.BlockSpec((Ch, 9 * Cin), lambda n: (0, 0)),
                pl.BlockSpec((Ch, 1), lambda n: (0, 0)),
                pl.BlockSpec((Cout, 9 * Ch), lambda n: (0, 0)),
                pl.BlockSpec((Cout, 1), lambda n: (0, 0)),
                pl.BlockSpec((Cout, Cin), lambda n: (0, 0)),
            ],
            out_specs=pl.BlockSpec((1, Cout, HW), lambda n: (n, 0, 0)),
            scratch_shapes=[
                pltpu.VMEM((9 * Cin, HW), jnp.float32),
                pltpu.VMEM((9 * Ch, HW), jnp.float32),
            ],
        ),
        compiler_params=pltpu.CompilerParams(
            # Batch items are independent -> sharded across the 2 TCs on v7x.
            dimension_semantics=("parallel",)),
    )(x3, hcoord, wcoord, w0p, b0c, w1p, b1c, ws2)

    return out3.reshape(N, Cout, H, W)                          # free reshape


if __name__ == "__main__":
    # Module config: fin=4, fout=8 -> learned_shortcut=True, fhidden=min(4,8)=4
    N, fin, fout, H, W = 2, 4, 8, 16, 16
    fh = min(fin, fout)

    key = jax.random.PRNGKey(0)
    k_x, k0, kb0, k1, kb1, ks = jax.random.split(key, 6)

    def uni(k, shape, fan_in):
        bound = 1.0 / (fan_in ** 0.5)
        return jax.random.uniform(k, shape, jnp.float32, -bound, bound)

    x = jax.random.normal(k_x, (N, fin, H, W), jnp.float32)

    # PyTorch-native (OIHW) parameter shapes.
    w0_pt = uni(k0, (fh, fin, 3, 3), fin * 9)       # conv_0.weight
    b0 = uni(kb0, (fh,), fin * 9)                   # conv_0.bias
    w1_pt = uni(k1, (fout, fh, 3, 3), fh * 9)       # conv_1.weight
    b1 = uni(kb1, (fout,), fh * 9)                  # conv_1.bias
    ws_pt = uni(ks, (fout, fin, 1, 1), fin)         # conv_s.weight (no bias)

    out = jax.block_until_ready(
        resnet_block_forward(x, w0_pt, b0, w1_pt, b1, ws_pt))

    # Pure-JAX NCHW reference of the PyTorch forward.
    relu = lambda v: jnp.maximum(v, 0.0)

    def conv(v, w, b=None):
        y = lax.conv_general_dilated(v, w, (1, 1), "SAME",
                                     dimension_numbers=("NCHW", "OIHW", "NCHW"))
        return y if b is None else y + b.reshape(1, -1, 1, 1)

    x_s = conv(x, ws_pt)
    dx = conv(relu(x), w0_pt, b0)
    dx = conv(relu(dx), w1_pt, b1)
    ref = x_s + dx

    assert out.shape == (N, fout, H, W)
    err = float(jnp.max(jnp.abs(out - ref)))
    assert jnp.allclose(out, ref, rtol=1e-4, atol=1e-4), err
    print("KERNEL_OK")
</pallas_src>

<mosaic_0001>
module attributes {stable_mosaic.version = 11 : i64} {
  func.func @_resnet_block_kernel(%arg0: i32, %arg1: memref<1x4x256xf32, #tpu.memory_space<vmem>>, %arg2: memref<1x256xi32, #tpu.memory_space<vmem>>, %arg3: memref<1x256xi32, #tpu.memory_space<vmem>>, %arg4: memref<4x36xf32, #tpu.memory_space<vmem>>, %arg5: memref<4x1xf32, #tpu.memory_space<vmem>>, %arg6: memref<8x36xf32, #tpu.memory_space<vmem>>, %arg7: memref<8x1xf32, #tpu.memory_space<vmem>>, %arg8: memref<8x4xf32, #tpu.memory_space<vmem>>, %arg9: memref<1x8x256xf32, #tpu.memory_space<vmem>>, %arg10: memref<36x256xf32, #tpu.memory_space<vmem>>, %arg11: memref<36x256xf32, #tpu.memory_space<vmem>>) attributes {dimension_semantics = [#tpu.dimension_semantics<parallel>], iteration_bounds = array<i64: 2>, scalar_prefetch = 0 : i64, scratch_operands = 2 : i64, tpu.core_type = #tpu.core_type<tc>, window_params = [{transform_indices = @transform_0, window_bounds = array<i64: 1, 4, 256>}, {pipeline_mode = #tpu.pipeline_mode<synchronous>, transform_indices = @transform_1, window_bounds = array<i64: 1, 256>}, {pipeline_mode = #tpu.pipeline_mode<synchronous>, transform_indices = @transform_2, window_bounds = array<i64: 1, 256>}, {pipeline_mode = #tpu.pipeline_mode<synchronous>, transform_indices = @transform_3, window_bounds = array<i64: 4, 36>}, {pipeline_mode = #tpu.pipeline_mode<synchronous>, transform_indices = @transform_4, window_bounds = array<i64: 4, 1>}, {pipeline_mode = #tpu.pipeline_mode<synchronous>, transform_indices = @transform_5, window_bounds = array<i64: 8, 36>}, {pipeline_mode = #tpu.pipeline_mode<synchronous>, transform_indices = @transform_6, window_bounds = array<i64: 8, 1>}, {pipeline_mode = #tpu.pipeline_mode<synchronous>, transform_indices = @transform_7, window_bounds = array<i64: 8, 4>}, {transform_indices = @transform_8, window_bounds = array<i64: 1, 8, 256>}]} {
    %c0 = arith.constant 0 : index
    %c0_0 = arith.constant 0 : index
    %0 = vector.load %arg2[%c0, %c0_0] : memref<1x256xi32, #tpu.memory_space<vmem>>, vector<1x256xi32>
    %c0_1 = arith.constant 0 : index
    %c0_2 = arith.constant 0 : index
    %1 = vector.load %arg3[%c0_1, %c0_2] : memref<1x256xi32, #tpu.memory_space<vmem>>, vector<1x256xi32>
    %c0_3 = arith.constant 0 : index
    %c0_4 = arith.constant 0 : index
    %c0_5 = arith.constant 0 : index
    %2 = vector.load %arg1[%c0_3, %c0_4, %c0_5] : memref<1x4x256xf32, #tpu.memory_space<vmem>>, vector<1x4x256xf32>
    %3 = vector.shape_cast %2 : vector<1x4x256xf32> to vector<4x256xf32>
    %c0_6 = arith.constant 0 : index
    %c0_7 = arith.constant 0 : index
    %4 = vector.load %arg8[%c0_6, %c0_7] : memref<8x4xf32, #tpu.memory_space<vmem>>, vector<8x4xf32>
    %cst = arith.constant dense<0.000000e+00> : vector<8x256xf32>
    %5 = tpu.matmul %4, %3, %cst {dimension_numbers = #tpu.dot_dimension_numbers<[1], [0], [0], [1], [0, 0, 1, 1], [], []>} : vector<8x4xf32>, vector<4x256xf32>, vector<8x256xf32> -> vector<8x256xf32>
    %cst_8 = arith.constant 0.000000e+00 : f32
    %6 = vector.broadcast %cst_8 : f32 to vector<4x256xf32>
    %7 = arith.maximumf %3, %6 : vector<4x256xf32>
    %c17_i32 = arith.constant 17 : i32
    %8 = tpu.dynamic_rotate %7 by %c17_i32 dim 1 : vector<4x256xf32>, i32 -> vector<4x256xf32>
    %c1_i32 = arith.constant 1 : i32
    %9 = vector.broadcast %c1_i32 : i32 to vector<1x256xi32>
    %10 = arith.cmpi sge, %0, %9 : vector<1x256xi32>
    %c1_i32_9 = arith.constant 1 : i32
    %11 = vector.broadcast %c1_i32_9 : i32 to vector<1x256xi32>
    %12 = arith.cmpi sge, %1, %11 : vector<1x256xi32>
    %13 = arith.andi %10, %12 : vector<1x256xi1>
    %cst_10 = arith.constant 0.000000e+00 : f32
    %14 = vector.shape_cast %13 : vector<1x256xi1> to vector<1x256xi1>
    %15 = vector.broadcast %14 : vector<1x256xi1> to vector<4x256xi1>
    %16 = vector.broadcast %cst_10 : f32 to vector<4x256xf32>
    %17 = arith.select %15, %8, %16 : vector<4x256xi1>, vector<4x256xf32>
    %c0_11 = arith.constant 0 : index
    %c0_12 = arith.constant 0 : index
    %18 = vector.load %arg10[%c0_11, %c0_12] : memref<36x256xf32, #tpu.memory_space<vmem>>, vector<4x256xf32>
    tpu.vector_store %arg10[%c0_11, %c0_12], %17 {strides = array<i32>} : memref<36x256xf32, #tpu.memory_space<vmem>>, vector<4x256xf32>,
    %c16_i32 = arith.constant 16 : i32
    %19 = tpu.dynamic_rotate %7 by %c16_i32 dim 1 : vector<4x256xf32>, i32 -> vector<4x256xf32>
    %c1_i32_13 = arith.constant 1 : i32
    %20 = vector.broadcast %c1_i32_13 : i32 to vector<1x256xi32>
    %21 = arith.cmpi sge, %0, %20 : vector<1x256xi32>
    %cst_14 = arith.constant 0.000000e+00 : f32
    %22 = vector.shape_cast %21 : vector<1x256xi1> to vector<1x256xi1>
    %23 = vector.broadcast %22 : vector<1x256xi1> to vector<4x256xi1>
    %24 = vector.broadcast %cst_14 : f32 to vector<4x256xf32>
    %25 = arith.select %23, %19, %24 : vector<4x256xi1>, vector<4x256xf32>
    %c4 = arith.constant 4 : index
    %c0_15 = arith.constant 0 : index
    %26 = vector.load %arg10[%c4, %c0_15] : memref<36x256xf32, #tpu.memory_space<vmem>>, vector<4x256xf32>
    tpu.vector_store %arg10[%c4, %c0_15], %25 {strides = array<i32>} : memref<36x256xf32, #tpu.memory_space<vmem>>, vector<4x256xf32>,
    %c15_i32 = arith.constant 15 : i32
    %27 = tpu.dynamic_rotate %7 by %c15_i32 dim 1 : vector<4x256xf32>, i32 -> vector<4x256xf32>
    %c1_i32_16 = arith.constant 1 : i32
    %28 = vector.broadcast %c1_i32_16 : i32 to vector<1x256xi32>
    %29 = arith.cmpi sge, %0, %28 : vector<1x256xi32>
    %c14_i32 = arith.constant 14 : i32
    %30 = vector.broadcast %c14_i32 : i32 to vector<1x256xi32>
    %31 = arith.cmpi sle, %1, %30 : vector<1x256xi32>
    %32 = arith.andi %29, %31 : vector<1x256xi1>
    %cst_17 = arith.constant 0.000000e+00 : f32
    %33 = vector.shape_cast %32 : vector<1x256xi1> to vector<1x256xi1>
    %34 = vector.broadcast %33 : vector<1x256xi1> to vector<4x256xi1>
    %35 = vector.broadcast %cst_17 : f32 to vector<4x256xf32>
    %36 = arith.select %34, %27, %35 : vector<4x256xi1>, vector<4x256xf32>
    %c8 = arith.constant 8 : index
    %c0_18 = arith.constant 0 : index
    %37 = vector.load %arg10[%c8, %c0_18] : memref<36x256xf32, #tpu.memory_space<vmem>>, vector<4x256xf32>
    tpu.vector_store %arg10[%c8, %c0_18], %36 {strides = array<i32>} : memref<36x256xf32, #tpu.memory_space<vmem>>, vector<4x256xf32>,
    %c1_i32_19 = arith.constant 1 : i32
    %38 = tpu.dynamic_rotate %7 by %c1_i32_19 dim 1 : vector<4x256xf32>, i32 -> vector<4x256xf32>
    %c1_i32_20 = arith.constant 1 : i32
    %39 = vector.broadcast %c1_i32_20 : i32 to vector<1x256xi32>
    %40 = arith.cmpi sge, %1, %39 : vector<1x256xi32>
    %cst_21 = arith.constant 0.000000e+00 : f32
    %41 = vector.shape_cast %40 : vector<1x256xi1> to vector<1x256xi1>
    %42 = vector.broadcast %41 : vector<1x256xi1> to vector<4x256xi1>
    %43 = vector.broadcast %cst_21 : f32 to vector<4x256xf32>
    %44 = arith.select %42, %38, %43 : vector<4x256xi1>, vector<4x256xf32>
    %c12 = arith.constant 12 : index
    %c0_22 = arith.constant 0 : index
    %45 = vector.load %arg10[%c12, %c0_22] : memref<36x256xf32, #tpu.memory_space<vmem>>, vector<4x256xf32>
    tpu.vector_store %arg10[%c12, %c0_22], %44 {strides = array<i32>} : memref<36x256xf32, #tpu.memory_space<vmem>>, vector<4x256xf32>,
    %c16 = arith.constant 16 : index
    %c0_23 = arith.constant 0 : index
    %46 = vector.load %arg10[%c16, %c0_23] : memref<36x256xf32, #tpu.memory_space<vmem>>, vector<4x256xf32>
    tpu.vector_store %arg10[%c16, %c0_23], %7 {strides = array<i32>} : memref<36x256xf32, #tpu.memory_space<vmem>>, vector<4x256xf32>,
    %c255_i32 = arith.constant 255 : i32
    %47 = tpu.dynamic_rotate %7 by %c255_i32 dim 1 : vector<4x256xf32>, i32 -> vector<4x256xf32>
    %c14_i32_24 = arith.constant 14 : i32
    %48 = vector.broadcast %c14_i32_24 : i32 to vector<1x256xi32>
    %49 = arith.cmpi sle, %1, %48 : vector<1x256xi32>
    %cst_25 = arith.constant 0.000000e+00 : f32
    %50 = vector.shape_cast %49 : vector<1x256xi1> to vector<1x256xi1>
    %51 = vector.broadcast %50 : vector<1x256xi1> to vector<4x256xi1>
    %52 = vector.broadcast %cst_25 : f32 to vector<4x256xf32>
    %53 = arith.select %51, %47, %52 : vector<4x256xi1>, vector<4x256xf32>
    %c20 = arith.constant 20 : index
    %c0_26 = arith.constant 0 : index
    %54 = vector.load %arg10[%c20, %c0_26] : memref<36x256xf32, #tpu.memory_space<vmem>>, vector<4x256xf32>
    tpu.vector_store %arg10[%c20, %c0_26], %53 {strides = array<i32>} : memref<36x256xf32, #tpu.memory_space<vmem>>, vector<4x256xf32>,
    %c241_i32 = arith.constant 241 : i32
    %55 = tpu.dynamic_rotate %7 by %c241_i32 dim 1 : vector<4x256xf32>, i32 -> vector<4x256xf32>
    %c14_i32_27 = arith.constant 14 : i32
    %56 = vector.broadcast %c14_i32_27 : i32 to vector<1x256xi32>
    %57 = arith.cmpi sle, %0, %56 : vector<1x256xi32>
    %c1_i32_28 = arith.constant 1 : i32
    %58 = vector.broadcast %c1_i32_28 : i32 to vector<1x256xi32>
    %59 = arith.cmpi sge, %1, %58 : vector<1x256xi32>
    %60 = arith.andi %57, %59 : vector<1x256xi1>
    %cst_29 = arith.constant 0.000000e+00 : f32
    %61 = vector.shape_cast %60 : vector<1x256xi1> to vector<1x256xi1>
    %62 = vector.broadcast %61 : vector<1x256xi1> to vector<4x256xi1>
    %63 = vector.broadcast %cst_29 : f32 to vector<4x256xf32>
    %64 = arith.select %62, %55, %63 : vector<4x256xi1>, vector<4x256xf32>
    %c24 = arith.constant 24 : index
    %c0_30 = arith.constant 0 : index
    %65 = vector.load %arg10[%c24, %c0_30] : memref<36x256xf32, #tpu.memory_space<vmem>>, vector<4x256xf32>
    tpu.vector_store %arg10[%c24, %c0_30], %64 {strides = array<i32>} : memref<36x256xf32, #tpu.memory_space<vmem>>, vector<4x256xf32>,
    %c240_i32 = arith.constant 240 : i32
    %66 = tpu.dynamic_rotate %7 by %c240_i32 dim 1 : vector<4x256xf32>, i32 -> vector<4x256xf32>
    %c14_i32_31 = arith.constant 14 : i32
    %67 = vector.broadcast %c14_i32_31 : i32 to vector<1x256xi32>
    %68 = arith.cmpi sle, %0, %67 : vector<1x256xi32>
    %cst_32 = arith.constant 0.000000e+00 : f32
    %69 = vector.shape_cast %68 : vector<1x256xi1> to vector<1x256xi1>
    %70 = vector.broadcast %69 : vector<1x256xi1> to vector<4x256xi1>
    %71 = vector.broadcast %cst_32 : f32 to vector<4x256xf32>
    %72 = arith.select %70, %66, %71 : vector<4x256xi1>, vector<4x256xf32>
    %c28 = arith.constant 28 : index
    %c0_33 = arith.constant 0 : index
    %73 = vector.load %arg10[%c28, %c0_33] : memref<36x256xf32, #tpu.memory_space<vmem>>, vector<4x256xf32>
    tpu.vector_store %arg10[%c28, %c0_33], %72 {strides = array<i32>} : memref<36x256xf32, #tpu.memory_space<vmem>>, vector<4x256xf32>,
    %c239_i32 = arith.constant 239 : i32
    %74 = tpu.dynamic_rotate %7 by %c239_i32 dim 1 : vector<4x256xf32>, i32 -> vector<4x256xf32>
    %c14_i32_34 = arith.constant 14 : i32
    %75 = vector.broadcast %c14_i32_34 : i32 to vector<1x256xi32>
    %76 = arith.cmpi sle, %0, %75 : vector<1x256xi32>
    %c14_i32_35 = arith.constant 14 : i32
    %77 = vector.broadcast %c14_i32_35 : i32 to vector<1x256xi32>
    %78 = arith.cmpi sle, %1, %77 : vector<1x256xi32>
    %79 = arith.andi %76, %78 : vector<1x256xi1>
    %cst_36 = arith.constant 0.000000e+00 : f32
    %80 = vector.shape_cast %79 : vector<1x256xi1> to vector<1x256xi1>
    %81 = vector.broadcast %80 : vector<1x256xi1> to vector<4x256xi1>
    %82 = vector.broadcast %cst_36 : f32 to vector<4x256xf32>
    %83 = arith.select %81, %74, %82 : vector<4x256xi1>, vector<4x256xf32>
    %c32 = arith.constant 32 : index
    %c0_37 = arith.constant 0 : index
    %84 = vector.load %arg10[%c32, %c0_37] : memref<36x256xf32, #tpu.memory_space<vmem>>, vector<4x256xf32>
    tpu.vector_store %arg10[%c32, %c0_37], %83 {strides = array<i32>} : memref<36x256xf32, #tpu.memory_space<vmem>>, vector<4x256xf32>,
    %c0_38 = arith.constant 0 : index
    %c0_39 = arith.constant 0 : index
    %85 = vector.load %arg4[%c0_38, %c0_39] : memref<4x36xf32, #tpu.memory_space<vmem>>, vector<4x36xf32>
    %c0_40 = arith.constant 0 : index
    %c0_41 = arith.constant 0 : index
    %86 = vector.load %arg10[%c0_40, %c0_41] : memref<36x256xf32, #tpu.memory_space<vmem>>, vector<36x256xf32>
    %cst_42 = arith.constant dense<0.000000e+00> : vector<4x256xf32>
    %87 = tpu.matmul %85, %86, %cst_42 {dimension_numbers = #tpu.dot_dimension_numbers<[1], [0], [0], [1], [0, 0, 1, 1], [], []>} : vector<4x36xf32>, vector<36x256xf32>, vector<4x256xf32> -> vector<4x256xf32>
    %c0_43 = arith.constant 0 : index
    %c0_44 = arith.constant 0 : index
    %88 = vector.load %arg5[%c0_43, %c0_44] : memref<4x1xf32, #tpu.memory_space<vmem>>, vector<4x1xf32>
    %89 = vector.broadcast %88 : vector<4x1xf32> to vector<4x256xf32>
    %90 = arith.addf %87, %89 : vector<4x256xf32>
    %cst_45 = arith.constant 0.000000e+00 : f32
    %91 = vector.broadcast %cst_45 : f32 to vector<4x256xf32>
    %92 = arith.maximumf %90, %91 : vector<4x256xf32>
    %c17_i32_46 = arith.constant 17 : i32
    %93 = tpu.dynamic_rotate %92 by %c17_i32_46 dim 1 : vector<4x256xf32>, i32 -> vector<4x256xf32>
    %c1_i32_47 = arith.constant 1 : i32
    %94 = vector.broadcast %c1_i32_47 : i32 to vector<1x256xi32>
    %95 = arith.cmpi sge, %0, %94 : vector<1x256xi32>
    %c1_i32_48 = arith.constant 1 : i32
    %96 = vector.broadcast %c1_i32_48 : i32 to vector<1x256xi32>
    %97 = arith.cmpi sge, %1, %96 : vector<1x256xi32>
    %98 = arith.andi %95, %97 : vector<1x256xi1>
    %cst_49 = arith.constant 0.000000e+00 : f32
    %99 = vector.shape_cast %98 : vector<1x256xi1> to vector<1x256xi1>
    %100 = vector.broadcast %99 : vector<1x256xi1> to vector<4x256xi1>
    %101 = vector.broadcast %cst_49 : f32 to vector<4x256xf32>
    %102 = arith.select %100, %93, %101 : vector<4x256xi1>, vector<4x256xf32>
    %c0_50 = arith.constant 0 : index
    %c0_51 = arith.constant 0 : index
    %103 = vector.load %arg11[%c0_50, %c0_51] : memref<36x256xf32, #tpu.memory_space<vmem>>, vector<4x256xf32>
    tpu.vector_store %arg11[%c0_50, %c0_51], %102 {strides = array<i32>} : memref<36x256xf32, #tpu.memory_space<vmem>>, vector<4x256xf32>,
    %c16_i32_52 = arith.constant 16 : i32
    %104 = tpu.dynamic_rotate %92 by %c16_i32_52 dim 1 : vector<4x256xf32>, i32 -> vector<4x256xf32>
    %c1_i32_53 = arith.constant 1 : i32
    %105 = vector.broadcast %c1_i32_53 : i32 to vector<1x256xi32>
    %106 = arith.cmpi sge, %0, %105 : vector<1x256xi32>
    %cst_54 = arith.constant 0.000000e+00 : f32
    %107 = vector.shape_cast %106 : vector<1x256xi1> to vector<1x256xi1>
    %108 = vector.broadcast %107 : vector<1x256xi1> to vector<4x256xi1>
    %109 = vector.broadcast %cst_54 : f32 to vector<4x256xf32>
    %110 = arith.select %108, %104, %109 : vector<4x256xi1>, vector<4x256xf32>
    %c4_55 = arith.constant 4 : index
    %c0_56 = arith.constant 0 : index
    %111 = vector.load %arg11[%c4_55, %c0_56] : memref<36x256xf32, #tpu.memory_space<vmem>>, vector<4x256xf32>
    tpu.vector_store %arg11[%c4_55, %c0_56], %110 {strides = array<i32>} : memref<36x256xf32, #tpu.memory_space<vmem>>, vector<4x256xf32>,
    %c15_i32_57 = arith.constant 15 : i32
    %112 = tpu.dynamic_rotate %92 by %c15_i32_57 dim 1 : vector<4x256xf32>, i32 -> vector<4x256xf32>
    %c1_i32_58 = arith.constant 1 : i32
    %113 = vector.broadcast %c1_i32_58 : i32 to vector<1x256xi32>
    %114 = arith.cmpi sge, %0, %113 : vector<1x256xi32>
    %c14_i32_59 = arith.constant 14 : i32
    %115 = vector.broadcast %c14_i32_59 : i32 to vector<1x256xi32>
    %116 = arith.cmpi sle, %1, %115 : vector<1x256xi32>
    %117 = arith.andi %114, %116 : vector<1x256xi1>
    %cst_60 = arith.constant 0.000000e+00 : f32
    %118 = vector.shape_cast %117 : vector<1x256xi1> to vector<1x256xi1>
    %119 = vector.broadcast %118 : vector<1x256xi1> to vector<4x256xi1>
    %120 = vector.broadcast %cst_60 : f32 to vector<4x256xf32>
    %121 = arith.select %119, %112, %120 : vector<4x256xi1>, vector<4x256xf32>
    %c8_61 = arith.constant 8 : index
    %c0_62 = arith.constant 0 : index
    %122 = vector.load %arg11[%c8_61, %c0_62] : memref<36x256xf32, #tpu.memory_space<vmem>>, vector<4x256xf32>
    tpu.vector_store %arg11[%c8_61, %c0_62], %121 {strides = array<i32>} : memref<36x256xf32, #tpu.memory_space<vmem>>, vector<4x256xf32>,
    %c1_i32_63 = arith.constant 1 : i32
    %123 = tpu.dynamic_rotate %92 by %c1_i32_63 dim 1 : vector<4x256xf32>, i32 -> vector<4x256xf32>
    %c1_i32_64 = arith.constant 1 : i32
    %124 = vector.broadcast %c1_i32_64 : i32 to vector<1x256xi32>
    %125 = arith.cmpi sge, %1, %124 : vector<1x256xi32>
    %cst_65 = arith.constant 0.000000e+00 : f32
    %126 = vector.shape_cast %125 : vector<1x256xi1> to vector<1x256xi1>
    %127 = vector.broadcast %126 : vector<1x256xi1> to vector<4x256xi1>
    %128 = vector.broadcast %cst_65 : f32 to vector<4x256xf32>
    %129 = arith.select %127, %123, %128 : vector<4x256xi1>, vector<4x256xf32>
    %c12_66 = arith.constant 12 : index
    %c0_67 = arith.constant 0 : index
    %130 = vector.load %arg11[%c12_66, %c0_67] : memref<36x256xf32, #tpu.memory_space<vmem>>, vector<4x256xf32>
    tpu.vector_store %arg11[%c12_66, %c0_67], %129 {strides = array<i32>} : memref<36x256xf32, #tpu.memory_space<vmem>>, vector<4x256xf32>,
    %c16_68 = arith.constant 16 : index
    %c0_69 = arith.constant 0 : index
    %131 = vector.load %arg11[%c16_68, %c0_69] : memref<36x256xf32, #tpu.memory_space<vmem>>, vector<4x256xf32>
    tpu.vector_store %arg11[%c16_68, %c0_69], %92 {strides = array<i32>} : memref<36x256xf32, #tpu.memory_space<vmem>>, vector<4x256xf32>,
    %c255_i32_70 = arith.constant 255 : i32
    %132 = tpu.dynamic_rotate %92 by %c255_i32_70 dim 1 : vector<4x256xf32>, i32 -> vector<4x256xf32>
    %c14_i32_71 = arith.constant 14 : i32
    %133 = vector.broadcast %c14_i32_71 : i32 to vector<1x256xi32>
    %134 = arith.cmpi sle, %1, %133 : vector<1x256xi32>
    %cst_72 = arith.constant 0.000000e+00 : f32
    %135 = vector.shape_cast %134 : vector<1x256xi1> to vector<1x256xi1>
    %136 = vector.broadcast %135 : vector<1x256xi1> to vector<4x256xi1>
    %137 = vector.broadcast %cst_72 : f32 to vector<4x256xf32>
    %138 = arith.select %136, %132, %137 : vector<4x256xi1>, vector<4x256xf32>
    %c20_73 = arith.constant 20 : index
    %c0_74 = arith.constant 0 : index
    %139 = vector.load %arg11[%c20_73, %c0_74] : memref<36x256xf32, #tpu.memory_space<vmem>>, vector<4x256xf32>
    tpu.vector_store %arg11[%c20_73, %c0_74], %138 {strides = array<i32>} : memref<36x256xf32, #tpu.memory_space<vmem>>, vector<4x256xf32>,
    %c241_i32_75 = arith.constant 241 : i32
    %140 = tpu.dynamic_rotate %92 by %c241_i32_75 dim 1 : vector<4x256xf32>, i32 -> vector<4x256xf32>
    %c14_i32_76 = arith.constant 14 : i32
    %141 = vector.broadcast %c14_i32_76 : i32 to vector<1x256xi32>
    %142 = arith.cmpi sle, %0, %141 : vector<1x256xi32>
    %c1_i32_77 = arith.constant 1 : i32
    %143 = vector.broadcast %c1_i32_77 : i32 to vector<1x256xi32>
    %144 = arith.cmpi sge, %1, %143 : vector<1x256xi32>
    %145 = arith.andi %142, %144 : vector<1x256xi1>
    %cst_78 = arith.constant 0.000000e+00 : f32
    %146 = vector.shape_cast %145 : vector<1x256xi1> to vector<1x256xi1>
    %147 = vector.broadcast %146 : vector<1x256xi1> to vector<4x256xi1>
    %148 = vector.broadcast %cst_78 : f32 to vector<4x256xf32>
    %149 = arith.select %147, %140, %148 : vector<4x256xi1>, vector<4x256xf32>
    %c24_79 = arith.constant 24 : index
    %c0_80 = arith.constant 0 : index
    %150 = vector.load %arg11[%c24_79, %c0_80] : memref<36x256xf32, #tpu.memory_space<vmem>>, vector<4x256xf32>
    tpu.vector_store %arg11[%c24_79, %c0_80], %149 {strides = array<i32>} : memref<36x256xf32, #tpu.memory_space<vmem>>, vector<4x256xf32>,
    %c240_i32_81 = arith.constant 240 : i32
    %151 = tpu.dynamic_rotate %92 by %c240_i32_81 dim 1 : vector<4x256xf32>, i32 -> vector<4x256xf32>
    %c14_i32_82 = arith.constant 14 : i32
    %152 = vector.broadcast %c14_i32_82 : i32 to vector<1x256xi32>
    %153 = arith.cmpi sle, %0, %152 : vector<1x256xi32>
    %cst_83 = arith.constant 0.000000e+00 : f32
    %154 = vector.shape_cast %153 : vector<1x256xi1> to vector<1x256xi1>
    %155 = vector.broadcast %154 : vector<1x256xi1> to vector<4x256xi1>
    %156 = vector.broadcast %cst_83 : f32 to vector<4x256xf32>
    %157 = arith.select %155, %151, %156 : vector<4x256xi1>, vector<4x256xf32>
    %c28_84 = arith.constant 28 : index
    %c0_85 = arith.constant 0 : index
    %158 = vector.load %arg11[%c28_84, %c0_85] : memref<36x256xf32, #tpu.memory_space<vmem>>, vector<4x256xf32>
    tpu.vector_store %arg11[%c28_84, %c0_85], %157 {strides = array<i32>} : memref<36x256xf32, #tpu.memory_space<vmem>>, vector<4x256xf32>,
    %c239_i32_86 = arith.constant 239 : i32
    %159 = tpu.dynamic_rotate %92 by %c239_i32_86 dim 1 : vector<4x256xf32>, i32 -> vector<4x256xf32>
    %c14_i32_87 = arith.constant 14 : i32
    %160 = vector.broadcast %c14_i32_87 : i32 to vector<1x256xi32>
    %161 = arith.cmpi sle, %0, %160 : vector<1x256xi32>
    %c14_i32_88 = arith.constant 14 : i32
    %162 = vector.broadcast %c14_i32_88 : i32 to vector<1x256xi32>
    %163 = arith.cmpi sle, %1, %162 : vector<1x256xi32>
    %164 = arith.andi %161, %163 : vector<1x256xi1>
    %cst_89 = arith.constant 0.000000e+00 : f32
    %165 = vector.shape_cast %164 : vector<1x256xi1> to vector<1x256xi1>
    %166 = vector.broadcast %165 : vector<1x256xi1> to vector<4x256xi1>
    %167 = vector.broadcast %cst_89 : f32 to vector<4x256xf32>
    %168 = arith.select %166, %159, %167 : vector<4x256xi1>, vector<4x256xf32>
    %c32_90 = arith.constant 32 : index
    %c0_91 = arith.constant 0 : index
    %169 = vector.load %arg11[%c32_90, %c0_91] : memref<36x256xf32, #tpu.memory_space<vmem>>, vector<4x256xf32>
    tpu.vector_store %arg11[%c32_90, %c0_91], %168 {strides = array<i32>} : memref<36x256xf32, #tpu.memory_space<vmem>>, vector<4x256xf32>,
    %c0_92 = arith.constant 0 : index
    %c0_93 = arith.constant 0 : index
    %170 = vector.load %arg6[%c0_92, %c0_93] : memref<8x36xf32, #tpu.memory_space<vmem>>, vector<8x36xf32>
    %c0_94 = arith.constant 0 : index
    %c0_95 = arith.constant 0 : index
    %171 = vector.load %arg11[%c0_94, %c0_95] : memref<36x256xf32, #tpu.memory_space<vmem>>, vector<36x256xf32>
    %cst_96 = arith.constant dense<0.000000e+00> : vector<8x256xf32>
    %172 = tpu.matmul %170, %171, %cst_96 {dimension_numbers = #tpu.dot_dimension_numbers<[1], [0], [0], [1], [0, 0, 1, 1], [], []>} : vector<8x36xf32>, vector<36x256xf32>, vector<8x256xf32> -> vector<8x256xf32>
    %c0_97 = arith.constant 0 : index
    %c0_98 = arith.constant 0 : index
    %173 = vector.load %arg7[%c0_97, %c0_98] : memref<8x1xf32, #tpu.memory_space<vmem>>, vector<8x1xf32>
    %174 = vector.broadcast %173 : vector<8x1xf32> to vector<8x256xf32>
    %175 = arith.addf %172, %174 : vector<8x256xf32>
    %176 = arith.addf %5, %175 : vector<8x256xf32>
    %c0_99 = arith.constant 0 : index
    %c0_100 = arith.constant 0 : index
    %c0_101 = arith.constant 0 : index
    %177 = vector.load %arg9[%c0_99, %c0_100, %c0_101] : memref<1x8x256xf32, #tpu.memory_space<vmem>>, vector<1x8x256xf32>
    %178 = vector.shape_cast %177 : vector<1x8x256xf32> to vector<8x256xf32>
    %179 = vector.shape_cast %176 : vector<8x256xf32> to vector<1x8x256xf32>
    tpu.vector_store %arg9[%c0_99, %c0_100, %c0_101], %179 {strides = array<i32>} : memref<1x8x256xf32, #tpu.memory_space<vmem>>, vector<1x8x256xf32>,
    return
  }
  func.func @transform_0(%arg0: i32) -> (i32, i32, i32) {
    %c0_i32 = arith.constant 0 : i32
    %c0_i32_0 = arith.constant 0 : i32
    %c0_i32_1 = arith.constant 0 : i32
    return %arg0, %c0_i32, %c0_i32_0 : i32, i32, i32
  }
  func.func @transform_1(%arg0: i32) -> (i32, i32) {
    %c0_i32 = arith.constant 0 : i32
    %c0_i32_0 = arith.constant 0 : i32
    %c0_i32_1 = arith.constant 0 : i32
    return %c0_i32, %c0_i32_0 : i32, i32
  }
  func.func @transform_2(%arg0: i32) -> (i32, i32) {
    %c0_i32 = arith.constant 0 : i32
    %c0_i32_0 = arith.constant 0 : i32
    %c0_i32_1 = arith.constant 0 : i32
    return %c0_i32, %c0_i32_0 : i32, i32
  }
  func.func @transform_3(%arg0: i32) -> (i32, i32) {
    %c0_i32 = arith.constant 0 : i32
    %c0_i32_0 = arith.constant 0 : i32
    %c0_i32_1 = arith.constant 0 : i32
    return %c0_i32, %c0_i32_0 : i32, i32
  }
  func.func @transform_4(%arg0: i32) -> (i32, i32) {
    %c0_i32 = arith.constant 0 : i32
    %c0_i32_0 = arith.constant 0 : i32
    %c0_i32_1 = arith.constant 0 : i32
    return %c0_i32, %c0_i32_0 : i32, i32
  }
  func.func @transform_5(%arg0: i32) -> (i32, i32) {
    %c0_i32 = arith.constant 0 : i32
    %c0_i32_0 = arith.constant 0 : i32
    %c0_i32_1 = arith.constant 0 : i32
    return %c0_i32, %c0_i32_0 : i32, i32
  }
  func.func @transform_6(%arg0: i32) -> (i32, i32) {
    %c0_i32 = arith.constant 0 : i32
    %c0_i32_0 = arith.constant 0 : i32
    %c0_i32_1 = arith.constant 0 : i32
    return %c0_i32, %c0_i32_0 : i32, i32
  }
  func.func @transform_7(%arg0: i32) -> (i32, i32) {
    %c0_i32 = arith.constant 0 : i32
    %c0_i32_0 = arith.constant 0 : i32
    %c0_i32_1 = arith.constant 0 : i32
    return %c0_i32, %c0_i32_0 : i32, i32
  }
  func.func @transform_8(%arg0: i32) -> (i32, i32, i32) {
    %c0_i32 = arith.constant 0 : i32
    %c0_i32_0 = arith.constant 0 : i32
    %c0_i32_1 = arith.constant 0 : i32
    return %arg0, %c0_i32, %c0_i32_0 : i32, i32, i32
  }
}

</mosaic_0001>

<bundles_post_ra>
// kernel: tpu_custom_call.1
= control target key start
LH: loop header
LB: loop body
LE: loop exit
PB: predicated region body
PF: predicated region fallthrough
CT: control target
= control target key end

     0   :  { %13 = vsyncpa [#allocation5], 0  ;;  %s1703_s0 = inlined_call_operand.vmem [shape: f32[2,4,256], index: 0, kind: input, shape index: {}]   ;;  %s1704_s1 = inlined_call_operand.hbm [shape: s32[1,256], index: 1, kind: input, shape index: {}]   ;;  %s1705_s2 = inlined_call_operand.hbm [shape: s32[1,256], index: 2, kind: input, shape index: {}]   ;;  %s1706_s3 = inlined_call_operand.vmem [shape: f32[4,36], index: 3, kind: input, shape index: {}]   ;;  %s1707_s4 = inlined_call_operand.vmem [shape: f32[4,1], index: 4, kind: input, shape index: {}]   ;;  %s1708_s5 = inlined_call_operand.hbm [shape: f32[8,36], index: 5, kind: input, shape index: {}]   ;;  %s1709_s6 = inlined_call_operand.vmem [shape: f32[8,1], index: 6, kind: input, shape index: {}]   ;;  %s1710_s7 = inlined_call_operand.vmem [shape: f32[8,4], index: 7, kind: input, shape index: {}]   ;;  %s1711_s8 = inlined_call_operand.hbm [shape: f32[2,8,256], index: 8, kind: output, shape index: {}]  }
   0x1   :  { %14 = vsyncpa [#allocation8], 0 }
   0x2   :  { %15 = vsyncpa [#allocation6], 0 }
   0x3   :  { %17 = vsyncpa [#allocation6 + $0x1], 0  ;;  %s1298_s27 = smov 0   ;;  %s1300_s28 = smov 0  }
   0x4   :  { %s1302_s29 = smov 0   ;;  %s1304_s30 = smov 0  }
   0x5 LB: > { %s1319_s9 = sadd.s32 4294967295, %s1239_s30   ;;  %s966_s10 = sadd.s32 4294967294, %s1239_s30   ;;  %s1239_s30 = sphi %s1304_s30, %s1790_s30   ;;  %s1235_s29 = sphi %s1302_s29, %s1789_s29   ;;  %s1231_s28 = sphi %s1300_s28, %s1788_s28   ;;  %s1227_s27 = sphi %s1298_s27, %s1787_s27  }
   0x6   : > { %s1323_s11 = sadd.s32 1, %s1239_s30   ;;  %s203_s12 = sadd.s32 1, %s1235_s29 }
   0x7   : > { %s200_s13 = ssub.s32 %s1239_s30, %s1323_s11  ;;  %p213_p0 = scmp.ne.s32.totalorder %s1235_s29, %s1231_s28 }
   0x8   : > { %p201_p1 = scmp.eq.s32.totalorder %s200_s13, 0  ;;  %p214_p2 = scmp.eq.s32.totalorder %s1319_s9, 1 }
   0x9   : > { %p219_p3 = scmp.ne.s32.totalorder %s1231_s28, %s1227_s27  ;;  %p220_p4 = scmp.eq.s32.totalorder %s966_s10, 1 }
   0xa   : > { %s1334_s14 = scalar_select %p201_p1, %s1235_s29, %s203_s12  }
   0xb   : > { %p1336_p5 = por %p214_p2, %p213_p0  ;;  %p1340_p6 = por %p220_p4, %p219_p3 }
   0xc   : > { %p967_p7 = scmp.ge.s32.totalorder %s1239_s30, 1  ;;  %p227_p8 = scmp.lt.s32.totalorder %s1239_s30, 3 }
   0xd   : > { %p1026_p9 = scmp.eq.s32.totalorder %s1319_s9, 0  ;;  %s251_s20 = sshll.u32 %s1705_s2, 4  ;;  %s252_s20 = int_to_ptr.hbm [resolvable:$true] %s251_s20 }
   0xe   : > { %p1347_p10 = pnand %p967_p7, %p227_p8  ;;  %s1241_s21 = smov [#allocation7]  }
   0xf   : > { %s253_s22 = sshll.u32 %s1241_s21, 4  ;;  %s239_s25 = sshll.u32 %s1704_s1, 4  ;;  %s254_s22 = int_to_ptr.vmem [resolvable:$true] %s253_s22  ;;  %s240_s25 = int_to_ptr.hbm [resolvable:$true] %s239_s25 }
  0x10   : > { %p1012_p11 = pneg %p1347_p10  ;;  %s269_s12 = sshll.u32 %s1708_s5, 4  ;;  %s270_s12 = int_to_ptr.hbm [resolvable:$true] %s269_s12 }
  0x11   : > { %s1242_s13 = smov [#allocation4]   ;;  %s1243_s19 = smov [#allocation9]  }
  0x12   : > { %p1013_p12 = pnand %p1026_p9, %p1012_p11  ;;  %s241_s18 = sshll.u32 %s1242_s13, 4  ;;  %s242_s18 = int_to_ptr.vmem [resolvable:$true] %s241_s18 }
  0x13   : > { %s271_s21 = sshll.u32 %s1243_s19, 4  ;;  %298 = sbr.rel (%p1347_p10) target bundleno = 683 (0x2ab), region = 52  ;;  %s272_s21 = int_to_ptr.vmem [resolvable:$true] %s271_s21 }
  0x14   : > { %1018 = dma.hbm_to_vmem [thread:$0]  (!%p1013_p12), %s252_s20, 32, %s254_s22, [#allocation8]  }
  0x15   : > { %1015 = dma.hbm_to_vmem [thread:$0]  (!%p1013_p12), %s240_s25, 32, %s242_s18, [#allocation5]  }
  0x16   : > { %1021 = dma.hbm_to_vmem [thread:$0]  (!%p1013_p12), %s270_s12, 128, %s272_s21, [#allocation8]  }
  0x18   : > { %1214 = dma.done.wait (%p1026_p9), [#allocation5], 32  }
  0x19   : > { %1216 = vsyncadd (%p1026_p9), [#allocation5], 4294967264 }
  0x1a   : > { %1218 = dma.done.wait (%p1026_p9), [#allocation8], 160  }
  0x1b   : > { %1220 = vsyncadd (%p1026_p9), [#allocation8], 4294967136  ;;  %p343_p13 = scmp.lt.s32.totalorder %s1319_s9, 1  ;;  %s1244_s25 = smov 16   ;;  %v1252_v20 = vmov 0   ;;  %v363_v23 = vlaneseq  ;;  %v1731_v30 = vmov 0 }
  0x1c   : > { %s1245_s26 = smov 15   ;;  %s1246_s10 = smov 1   ;;  %1077 = vset.pattern.permute.xlu1 %v1252_v20  ;;  %1078 = vset.pattern.permute.xlu0 %v1252_v20  ;;  %v1397_v21 = vld [vmem:[#allocation4] sm:$0x3]  ;;  %v349_v36 = vld [vmem:[#allocation7] sm:$0x3] }
  0x1d   : > { %s344_s20 = scalar_select %p343_p13, %s1319_s9, 1  ;;  %vm368_vm0 = vcmp.ge.s32.totalorder %v1397_v21, 1  ;;  %v1403_v25 = vand.u32 127, %v363_v23  ;;  %vm369_vm4 = vcmp.ge.s32.totalorder %v349_v36, 1  ;;  %vm419_vm9 = vcmp.le.s32.totalorder %v349_v36, 14 }
  0x1e   : > { %s1247_s12 = smov 127   ;;  %s1248_s13 = smov 113   ;;  %v392_v24 = vsel %vm368_vm0, 1, %v1252_v20  ;;  %v442_v40 = vsel %vm369_vm4, 1, %v1252_v20  ;;  %v476_v50 = vsel %vm419_vm9, 1, %v1252_v20  ;;  %vm503_vm12 = vcmp.le.s32.totalorder %v1397_v21, 14 }
  0x1f   : > { %s996_s22 = sshll.u32 %s344_s20, 3  ;;  %s1249_s18 = smov 112   ;;  %v393_v26 = vperm.slane %v392_v24, 0  ;;  %v394_v27 = vperm.slane %v392_v24, 1  ;;  %vm1712_vm1 = vcmp.lt.s32.totalorder %v1403_v25, 16  ;;  %v443_v42 = vperm.slane %v442_v40, 0  ;;  %vm504_vm13 = vmand %vm503_vm12, %vm369_vm4 }
  0x20   : > { %s347_s24 = scalar_lea.vmem %s1703_s0, %s996_s22  ;;  %s1250_s19 = smov 17   ;;  %v444_v43 = vperm.slane %v442_v40, 1  ;;  %vm1713_vm5 = vcmp.lt.s32.totalorder %v1403_v25, 1  ;;  %vm1715_vm8 = vcmp.lt.s32.totalorder %v1403_v25, 127  ;;  %v477_v57 = vperm.slane %v476_v50, 0 }
  0x21   : > { %v350_v0 = vld [vmem:[%s347_s24] sm:$0xff]  ;;  %s1251_s21 = smov 111   ;;  %vm1406_vm2 = vcmp.eq.s32.totalorder %v393_v26, 1  ;;  %vm1410_vm3 = vcmp.eq.s32.totalorder %v394_v27, 1  ;;  %vm1427_vm6 = vcmp.eq.s32.totalorder %v443_v42, 1  ;;  %v478_v58 = vperm.slane %v476_v50, 1 }
  0x22   : > { %v352_v1 = vmax.f32 %v350_v0, 0.0  ;;  %v1732_v30 = vsel %vm1410_vm3, 4294967295, %v1731_v30  ;;  %vm1431_vm7 = vcmp.eq.s32.totalorder %v444_v43, 1  ;;  %vm1450_vm10 = vcmp.eq.s32.totalorder %v477_v57, 1 }
  0x23   : > { %vm1454_vm11 = vcmp.eq.s32.totalorder %v478_v58, 1  ;;  %vm1714_vm14 = vcmp.lt.s32.totalorder %v1403_v25, 113  ;;  %v1751_v40 = vmov 0  ;;  %v1757_v57 = vmov 0 }
  0x24   : > { %354 = vst [vmem:[#allocation1] ss:$2 sm:$0xff] %v352_v1  ;;  %v1759_v58 = vmov 0 }
  0x2b   : > { %v355_v2 = vld.sshfl [vmem:[#allocation1] sm:$0xff pattern:$0x75316420]  ;;  %v356_v3 = vld.sshfl [vmem:[#allocation1 + $0x8] sm:$0xff pattern:$0x75316420] }
  0x2c   : > { %380 = vst [vmem:[#allocation1] ss:$2 sm:$0xff] %v352_v1 }
  0x33   : > { %v381_v4 = vld.sshfl [vmem:[#allocation1] sm:$0xff pattern:$0x75316420]  ;;  %v382_v5 = vld.sshfl [vmem:[#allocation1 + $0x8] sm:$0xff pattern:$0x75316420] }
  0x34   : > { %407 = vst [vmem:[#allocation1] ss:$2 sm:$0xff] %v352_v1  ;;  %385 = vrot.lane.b32.xlu1 %v381_v4, %s1244_s25  ;;  %387 = vrot.lane.b32.xlu2 %v382_v5, %s1244_s25 }
  0x3b   : > { %v408_v6 = vld.sshfl [vmem:[#allocation1] sm:$0xff pattern:$0x75316420]  ;;  %v409_v7 = vld.sshfl [vmem:[#allocation1 + $0x8] sm:$0xff pattern:$0x75316420] }
  0x3c   : > { %412 = vrot.lane.b32.xlu0 %v408_v6, %s1245_s26  ;;  %430 = vst [vmem:[#allocation1] ss:$2 sm:$0xff] %v352_v1 }
  0x43   : > { %v431_v8 = vld.sshfl [vmem:[#allocation1] sm:$0xff pattern:$0x75316420]  ;;  %v432_v9 = vld.sshfl [vmem:[#allocation1 + $0x8] sm:$0xff pattern:$0x75316420] }
  0x44   : > { %437 = vrot.lane.b32.xlu0 %v432_v9, %s1246_s10  ;;  %457 = vst [vmem:[#allocation1] ss:$2 sm:$0xff] %v352_v1  ;;  %435 = vrot.lane.b32.xlu2 %v431_v8, %s1246_s10 }
  0x4b   : > { %v458_v10 = vld.sshfl [vmem:[#allocation1] sm:$0xff pattern:$0x75316420]  ;;  %v459_v11 = vld.sshfl [vmem:[#allocation1 + $0x8] sm:$0xff pattern:$0x75316420] }
  0x4c   : > { %464 = vst [vmem:[#allocation1] ss:$2 sm:$0xff] %v352_v1 }
  0x4d   : > { %462 = vst [vmem:[#allocation2 + $0x48] sm:$0xf] %v458_v10 }
  0x4e   : > { %463 = vst [vmem:[#allocation2 + $0x28] sm:$0xf] %v459_v11 }
  0x53   : > { %v465_v12 = vld.sshfl [vmem:[#allocation1] sm:$0xff pattern:$0x75316420]  ;;  %v466_v13 = vld.sshfl [vmem:[#allocation1 + $0x8] sm:$0xff pattern:$0x75316420] }
  0x54   : > { %491 = vst [vmem:[#allocation1] ss:$2 sm:$0xff] %v352_v1  ;;  %469 = vrot.lane.b32.xlu2 %v465_v12, %s1247_s12 }
  0x5b   : > { %v492_v14 = vld.sshfl [vmem:[#allocation1] sm:$0xff pattern:$0x75316420]  ;;  %v493_v15 = vld.sshfl [vmem:[#allocation1 + $0x8] sm:$0xff pattern:$0x75316420] }
  0x5c   : > { %496 = vrot.lane.b32.xlu0 %v492_v14, %s1248_s13  ;;  %498 = vrot.lane.b32.xlu1 %v493_v15, %s1248_s13  ;;  %514 = vst [vmem:[#allocation1] ss:$2 sm:$0xff] %v352_v1  ;;  %v526_v14 = vsel %vm503_vm12, 1, %v1252_v20 }
  0x5d   : > { %471 = vrot.lane.b32.xlu2 %v466_v13, %s1247_s12  ;;  %v527_v15 = vperm.slane %v526_v14, 0 }
  0x63   : > { %v515_v16 = vld.sshfl [vmem:[#allocation1] sm:$0xff pattern:$0x75316420]  ;;  %v516_v17 = vld.sshfl [vmem:[#allocation1 + $0x8] sm:$0xff pattern:$0x75316420] }
  0x64   : > { %519 = vrot.lane.b32.xlu0 %v515_v16, %s1249_s18  ;;  %541 = vst [vmem:[#allocation1] ss:$2 sm:$0xff] %v352_v1  ;;  %v505_v1 = vsel %vm504_vm13, 1, %v1252_v20  ;;  %v528_v16 = vperm.slane %v526_v14, 1  ;;  %vm370_vm13 = vmand %vm368_vm0, %vm369_vm4  ;;  %vm1719_vm4 = vcmp.lt.s32.totalorder %v1403_v25, 111 }
  0x65   : > { %359 = vrot.lane.b32.xlu2 %v355_v2, %s1250_s19  ;;  %v506_v2 = vperm.slane %v505_v1, 0 }
  0x67   : > { %vm1468_vm15 = vcmp.eq.s32.totalorder %v506_v2, 1 }
  0x6b   : > { %v542_v18 = vld.sshfl [vmem:[#allocation1] sm:$0xff pattern:$0x75316420]  ;;  %v543_v19 = vld.sshfl [vmem:[#allocation1 + $0x8] sm:$0xff pattern:$0x75316420] }
  0x6c   : > { %521 = vrot.lane.b32.xlu0 %v516_v17, %s1249_s18  ;;  %546 = vrot.lane.b32.xlu1 %v542_v18, %s1251_s21  ;;  %806 = vst [vmem:[#allocation1] ss:$2 sm:$0xff] %v350_v0 }
  0x74   : > { %361 = vrot.lane.b32.xlu0 %v356_v3, %s1250_s19  ;;  %548 = vrot.lane.b32.xlu1 %v543_v19, %s1251_s21  ;;  %v507_v3 = vperm.slane %v505_v1, 1  ;;  %v371_v19 = vsel %vm370_vm13, 1, %v1252_v20 }
  0x7c   : > { %414 = vrot.lane.b32.xlu1 %v409_v7, %s1245_s26 }
  0x8e   : > { %v388_v22 = vpop.permute.xlu2 %387 }
  0x9e   : > { %v436_v28 = vpop.permute.xlu2 %435 }
  0xa6   : > { %v386_v31 = vpop.permute.xlu1 %385 }
  0xa7   : > { %v390_v32 = vsel %vm1712_vm1, %v386_v31, %v388_v22  ;;  %v391_v33 = vsel %vm1712_vm1, %v388_v22, %v386_v31  ;;  %vm1472_vm1 = vcmp.eq.s32.totalorder %v507_v3, 1  ;;  %v574_v22 = vld [vmem:[%s1707_s4] sm:$0xf] }
  0xa8   : > { %v397_v34 = vsel %vm1406_vm2, %v391_v33, 0.0  ;;  %v398_v35 = vsel %vm1410_vm3, %v390_v32, 0.0  ;;  %vm1502_vm3 = vcmp.eq.s32.totalorder %v528_v16, 1  ;;  %577 = vperm.xlu1 %1077, %v574_v22   ;;  %v372_v32 = vperm.slane %v371_v19, 0 }
  0xa9   : > { %v401_v37 = vrot.slane %v397_v34, 4  ;;  %v402_v38 = vrot.slane %v398_v35, 4  ;;  %v373_v35 = vperm.slane %v371_v19, 1 }
  0xab   : > { %405 = vst [vmem:[#allocation2 + $0x30] sm:$0xf0] %v401_v37 }
  0xac   : > { %406 = vst [vmem:[#allocation2] sm:$0xf0] %v402_v38  ;;  %v739_v38 = vld [vmem:[#allocation9] sm:$0xff] }
  0xae   : > { %v1422_v39 = vpop.permute.xlu0 %412  ;;  %v470_v41 = vpop.permute.xlu2 %469 }
  0xb6   : > { %v438_v46 = vpop.permute.xlu0 %437 }
  0xb7   : > { %v440_v47 = vsel %vm1713_vm5, %v436_v28, %v438_v46  ;;  %v441_v48 = vsel %vm1713_vm5, %v438_v46, %v436_v28  ;;  %v472_v49 = vpop.permute.xlu2 %471  ;;  %vm420_vm5 = vmand %vm368_vm0, %vm419_vm9  ;;  %vm1717_vm0 = vcmp.lt.s32.totalorder %v1403_v25, 17 }
  0xb8   : > { %v447_v51 = vsel %vm1427_vm6, %v441_v48, 0.0  ;;  %v448_v52 = vsel %vm1431_vm7, %v440_v47, 0.0  ;;  %v474_v53 = vsel %vm1715_vm8, %v470_v41, %v472_v49  ;;  %v475_v54 = vsel %vm1715_vm8, %v472_v49, %v470_v41 }
  0xb9   : > { %v451_v55 = vrot.slane %v447_v51, 4  ;;  %v452_v56 = vrot.slane %v448_v52, 4  ;;  %v481_v61 = vsel %vm1450_vm10, %v474_v53, 0.0  ;;  %v482_v62 = vsel %vm1454_vm11, %v475_v54, 0.0 }
  0xba   : > { %v485_v63 = vrot.slane %v481_v61, 4  ;;  %v486_v0 = vrot.slane %v482_v62, 4  ;;  %v421_v10 = vsel %vm420_vm5, 1, %v1252_v20  ;;  %vm553_vm5 = vmand %vm503_vm12, %vm419_vm9  ;;  %vm1498_vm8 = vcmp.eq.s32.totalorder %v527_v15, 1 }
  0xbb   : > { %455 = vst [vmem:[#allocation2 + $0x18] sm:$0xf0] %v451_v55  ;;  %v554_v21 = vsel %vm553_vm5, 1, %v1252_v20  ;;  %vm1521_vm9 = vcmp.eq.s32.totalorder %v372_v32, 1  ;;  %vm1525_vm12 = vcmp.eq.s32.totalorder %v373_v35, 1  ;;  %v422_v55 = vperm.slane %v421_v10, 0 }
  0xbc   : > { %456 = vst [vmem:[#allocation2 + $0x10] sm:$0xf0] %v452_v56  ;;  %v555_v36 = vperm.slane %v554_v21, 0  ;;  %v556_v37 = vperm.slane %v554_v21, 1  ;;  %v1752_v40 = vsel %vm1525_vm12, 4294967295, %v1751_v40  ;;  %v423_v56 = vperm.slane %v421_v10, 1 }
  0xbd   : > { %489 = vst [vmem:[#allocation2 + $0x48] sm:$0xf0] %v485_v63 }
  0xbe   : > { %490 = vst [vmem:[#allocation2 + $0x28] sm:$0xf0] %v486_v0  ;;  %vm1529_vm13 = vcmp.eq.s32.totalorder %v555_v36, 1  ;;  %vm1533_vm5 = vcmp.eq.s32.totalorder %v556_v37, 1 }
  0xbf   : > { %v360_v20 = vpop.permute.xlu2 %359 }
  0xce   : > { %v497_v6 = vpop.permute.xlu0 %496  ;;  %v499_v7 = vpop.permute.xlu1 %498 }
  0xcf   : > { %v501_v8 = vsel %vm1714_vm14, %v497_v6, %v499_v7  ;;  %v502_v9 = vsel %vm1714_vm14, %v499_v7, %v497_v6  ;;  %vm1718_vm14 = vcmp.lt.s32.totalorder %v1403_v25, 112 }
  0xd0   : > { %v510_v11 = vsel %vm1468_vm15, %v501_v8, 0.0  ;;  %v511_v12 = vsel %vm1472_vm1, %v502_v9, 0.0  ;;  %v569_v8 = vld [vmem:[#allocation2 + $0x28] sm:$0xff] }
  0xd1   : > { %512 = vst [vmem:[#allocation2 + $0x8] sm:$0xf] %v510_v11  ;;  %v563_v11 = vld [vmem:[%s1706_s3] sm:$0xf] }
  0xd2   : > { %513 = vst [vmem:[#allocation2 + $0x20] sm:$0xf] %v511_v12 }
  0xd6   : > { %v520_v13 = vpop.permute.xlu0 %519 }
  0xde   : > { %v522_v23 = vpop.permute.xlu0 %521  ;;  %v547_v24 = vpop.permute.xlu1 %546 }
  0xdf   : > { %v524_v26 = vsel %vm1718_vm14, %v520_v13, %v522_v23  ;;  %v525_v27 = vsel %vm1718_vm14, %v522_v23, %v520_v13  ;;  %vm1554_vm14 = vcmp.eq.s32.totalorder %v422_v55, 1 }
  0xe0   : > { %v531_v28 = vsel %vm1498_vm8, %v524_v26, 0.0  ;;  %v532_v31 = vsel %vm1502_vm3, %v525_v27, 0.0  ;;  %v1758_v57 = vsel %vm1554_vm14, 4294967295, %v1757_v57 }
  0xe1   : > { %v535_v33 = vrot.slane %v531_v28, 4  ;;  %v536_v34 = vrot.slane %v532_v31, 4 }
  0xe3   : > { %539 = vst [vmem:[#allocation2 + $0x8] sm:$0xf0] %v535_v33 }
  0xe4   : > { %540 = vst [vmem:[#allocation2 + $0x20] sm:$0xf0] %v536_v34 }
  0xe6   : > { %v362_v42 = vpop.permute.xlu0 %361  ;;  %v549_v43 = vpop.permute.xlu1 %548 }
  0xe7   : > { %v366_v47 = vsel %vm1717_vm0, %v360_v20, %v362_v42  ;;  %v367_v48 = vsel %vm1717_vm0, %v362_v42, %v360_v20  ;;  %v551_v49 = vsel %vm1719_vm4, %v547_v24, %v549_v43  ;;  %v552_v50 = vsel %vm1719_vm4, %v549_v43, %v547_v24 }
  0xe8   : > { %v376_v51 = vsel %vm1521_vm9, %v367_v48, 0.0  ;;  %v377_v52 = vsel %vm1525_vm12, %v366_v47, 0.0  ;;  %v559_v53 = vsel %vm1529_vm13, %v551_v49, 0.0  ;;  %v560_v54 = vsel %vm1533_vm5, %v552_v50, 0.0 }
  0xe9   : > { %378 = vst [vmem:[#allocation2 + $0x30] sm:$0xf] %v376_v51  ;;  %vm1721_vm0 = vcmp.lt.s32.totalorder %v1403_v25, 15  ;;  %vm1558_vm4 = vcmp.eq.s32.totalorder %v423_v56, 1  ;;  %vm1723_vm12 = vcmask 1043456  }
  0xea   : > { %379 = vst [vmem:[#allocation2] sm:$0xf] %v377_v52  ;;  %v1760_v58 = vsel %vm1558_vm4, 4294967295, %v1759_v58  ;;  %v570_v6 = vld [vmem:[#allocation2 + $0x8] sm:$0xff] }
  0xeb   : > { %561 = vst [vmem:[#allocation2 + $0x40] sm:$0xf] %v559_v53  ;;  %v571_v7 = vld [vmem:[#allocation2 + $0x20] sm:$0xff]  ;;  %v807_v56 = vld.sshfl [vmem:[#allocation1] sm:$0xff pattern:$0x75316420] }
  0xec   : > { %562 = vst [vmem:[#allocation2 + $0x38] sm:$0xf] %v560_v54 }
  0xee   : > { %v415_v61 = vpop.permute.xlu1 %414 }
  0xef   : > { %v417_v62 = vsel %vm1721_vm0, %v1422_v39, %v415_v61  ;;  %v418_v63 = vsel %vm1721_vm0, %v415_v61, %v1422_v39  ;;  %v568_v39 = vld [vmem:[#allocation2 + $0x48] sm:$0xff]  ;;  %vm1722_vm0 = vcmask 293888   ;;  %v808_v61 = vld.sshfl [vmem:[#allocation1 + $0x8] sm:$0xff pattern:$0x75316420] }
  0xf0   : > { %v426_v0 = vsel %vm1554_vm14, %v418_v63, 0.0  ;;  %v427_v1 = vsel %vm1558_vm4, %v417_v62, 0.0  ;;  %v564_v12 = vld [vmem:[#allocation2 + $0x30] sm:$0xff]  ;;  %vm1763_vm4 = vcmp.lt.s32.totalorder %v1403_v25, 112  ;;  %v351_v63 = vld [vmem:[%s1710_s7] sm:$0xff] }
  0xf1   : > { %428 = vst [vmem:[#allocation2 + $0x18] sm:$0xf] %v426_v0  ;;  %v565_v13 = vld [vmem:[#allocation2] sm:$0xff]  ;;  %vm1764_vm14 = vmmov %vm1763_vm4  ;;  %v750_v0 = vld [vmem:[%s1709_s6] sm:$0xff] }
  0xf2   : > { %429 = vst [vmem:[#allocation2 + $0x10] sm:$0xf] %v427_v1  ;;  %v572_v2 = vld [vmem:[#allocation2 + $0x40] sm:$0xf] }
  0xf3   : > { %979 = vmatpush.msk.msra.mxu0 %vm1723_vm12, %v572_v2  ;;  %v573_v3 = vld [vmem:[#allocation2 + $0x38] sm:$0xf] }
  0xf4   : > { %981 = vmatpush.msk.msra.mxu1 %vm1723_vm12, %v573_v3 }
  0xf5   : > { %603 = vmatpush.msra.mxu0 %v570_v6 }
  0xf6   : > { %623 = vmatpush.msra.mxu1 %v571_v7 }
  0xf7   : > { %604 = vmatpush.msra.mxu0 %v568_v39 }
  0xf8   : > { %624 = vmatpush.msra.mxu1 %v569_v8  ;;  %v566_v9 = vld [vmem:[#allocation2 + $0x18] sm:$0xff] }
  0xf9   : > { %605 = vmatpush.msra.mxu0 %v566_v9  ;;  %v567_v10 = vld [vmem:[#allocation2 + $0x10] sm:$0xff] }
  0xfa   : > { %625 = vmatpush.msra.mxu1 %v567_v10 }
  0xfb   : > { %606 = vmatpush.msra.mxu0 %v564_v12 }
  0xfc   : > { %626 = vmatpush.msra.mxu1 %v565_v13  ;;  %980 = vmatmul.msk.f32.vlgmr.msra.gmra.mxu0 %vm1722_vm0, %v563_v11 }
  0xfd   : > { %982 = vmatmul.msk.f32.vlgmr.msra.gmra.mxu1 %vm1722_vm0, %v563_v11  ;;  %vm1761_vm0 = vcmp.lt.s32.totalorder %v1403_v25, 111 }
  0xfe   : > { %vm1762_vm12 = vmmov %vm1761_vm0 }
 0x11a   : > { %v578_v14 = vpop.permute.xlu1 %577 }
 0x179   : > { %v608_v15 = vpop.f32.mrf.mxu0 }
 0x17a   : > { %v609_v16 = vadd.f32 %v608_v15, %v578_v14  ;;  %v628_v19 = vpop.f32.mrf.mxu1 }
 0x17b   : > { %v629_v22 = vadd.f32 %v628_v19, %v578_v14 }
 0x17c   : > { %v631_v23 = vmax.f32 %v609_v16, 0.0 }
 0x17d   : > { %v632_v24 = vmax.f32 %v629_v22, 0.0 }
 0x17e   : > { %685 = vst [vmem:[#allocation3 + $0x38] sm:$0xf] %v631_v23  ;;  %729 = vrot.lane.b32.xlu1 %v631_v23, %s1251_s21  ;;  %713 = vrot.lane.b32.xlu2 %v631_v23, %s1249_s18 }
 0x17f   : > { %686 = vst [vmem:[#allocation3 + $0x8] sm:$0xf] %v632_v24  ;;  %715 = vrot.lane.b32.xlu0 %v632_v24, %s1249_s18  ;;  %s997_s18 = sshll.u32 %s1319_s9, 4 }
 0x180   : > { %s871_s20 = scalar_lea.hbm %s1711_s8, %s997_s18 }
 0x181   : > { %s875_s17 = sshll.u32 %s871_s20, 4  ;;  %s876_s17 = int_to_ptr.hbm [resolvable:$true] %s875_s17 }
 0x182   : > { %s1183_s24 = sshra.s32 %s876_s17, 4  ;;  %s1184_s24 = int_to_ptr.hbm [resolvable:$true] %s1183_s24 }
 0x183   : > { %p1190_p3 = scmp.lt.s32.totalorder %s1184_s24, %s1711_s8 }
 0x186   : > { %689 = vrot.lane.b32.xlu1 %v632_v24, %s1247_s12  ;;  %731 = vrot.lane.b32.xlu2 %v632_v24, %s1251_s21 }
 0x187   : > { %687 = vrot.lane.b32.xlu0 %v631_v23, %s1247_s12  ;;  %s340_s12 = sand.u32 1, %s1231_s28  }
 0x188   : > { %s860_s9 = scalar_lea.sflag [#allocation6], %s340_s12 }
 0x18e   : > { %669 = vrot.lane.b32.xlu1 %v631_v23, %s1246_s10  ;;  %703 = vrot.lane.b32.xlu2 %v631_v23, %s1248_s13 }
 0x18f   : > { %705 = vrot.lane.b32.xlu0 %v632_v24, %s1248_s13  ;;  %s976_s13 = sshll.u32 %s340_s12, 4 }
 0x190   : > { %s342_s22 = scalar_lea.vmem [#allocation10], %s976_s13  ;;  %s1189_s13 = scalar_lea.hbm %s1711_s8, 32 }
 0x191   : > { %s873_s23 = sshll.u32 %s342_s22, 4  ;;  %s874_s23 = int_to_ptr.vmem [resolvable:$true] %s873_s23 }
 0x196   : > { %645 = vrot.lane.b32.xlu1 %v632_v24, %s1244_s25  ;;  %671 = vrot.lane.b32.xlu2 %v632_v24, %s1246_s10 }
 0x197   : > { %643 = vrot.lane.b32.xlu0 %v631_v23, %s1244_s25  ;;  %s1185_s25 = scalar_lea.hbm %s1184_s24, 16 }
 0x198   : > { %p1186_p0 = scmp.ne.s32.totalorder %s1184_s24, %s1185_s25  ;;  %p1191_p4 = scmp.lt.s32.totalorder %s1189_s13, %s1185_s25 }
 0x19a   : > { %p1187_p1 = pnand %p1186_p0, %p1336_p5  ;;  %p1192_p7 = por %p1191_p4, %p1190_p3 }
 0x19c   : > { %p1188_p2 = pneg %p1187_p1 }
 0x19e   : > { %633 = vrot.lane.b32.xlu1 %v631_v23, %s1250_s19  ;;  %659 = vrot.lane.b32.xlu2 %v631_v23, %s1245_s26  ;;  %p1193_p8 = pnand %p1192_p7, %p1188_p2 }
 0x19f   : > { %661 = vrot.lane.b32.xlu0 %v632_v24, %s1245_s26 }
 0x1a6   : > { %635 = vrot.lane.b32.xlu2 %v632_v24, %s1250_s19 }
 0x1a7   : > { %753 = vperm.xlu0 %1078, %v750_v0  }
 0x1d8   : > { %v714_v21 = vpop.permute.xlu2 %713 }
 0x1e0   : > { %v732_v26 = vpop.permute.xlu2 %731 }
 0x1e8   : > { %v704_v33 = vpop.permute.xlu2 %703 }
 0x1f0   : > { %v730_v27 = vpop.permute.xlu1 %729  ;;  %v672_v52 = vpop.permute.xlu2 %671 }
 0x1f1   : > { %v716_v28 = vpop.permute.xlu0 %715  ;;  %v733_v31 = vsel %vm1761_vm0, %v730_v27, %v732_v26  ;;  %v734_v32 = vsel %vm1762_vm12, %v732_v26, %v730_v27 }
 0x1f2   : > { %v717_v34 = vsel %vm1763_vm4, %v714_v21, %v716_v28  ;;  %v718_v35 = vsel %vm1764_vm14, %v716_v28, %v714_v21  ;;  %v735_v36 = vsel %vm1529_vm13, %v733_v31, 0.0  ;;  %v736_v37 = vsel %vm1533_vm5, %v734_v32, 0.0 }
 0x1f3   : > { %v719_v20 = vsel %vm1498_vm8, %v717_v34, 0.0  ;;  %v720_v42 = vsel %vm1502_vm3, %v718_v35, 0.0  ;;  %737 = vst [vmem:[#allocation3 + $0x28] sm:$0xf] %v735_v36  ;;  %vm1765_vm14 = vcmp.lt.s32.totalorder %v1403_v25, 127  ;;  %vm1767_vm3 = vcmask 1043456  }
 0x1f4   : > { %v723_v43 = vrot.slane %v719_v20, 4  ;;  %v724_v47 = vrot.slane %v720_v42, 4  ;;  %738 = vst [vmem:[#allocation3 + $0x20] sm:$0xf] %v736_v37  ;;  %vm1766_vm0 = vmmov %vm1765_vm14  ;;  %vm1769_vm4 = vcmp.lt.s32.totalorder %v1403_v25, 1  ;;  %vm809_vm13 = vcmask 31744  }
 0x1f5   : > { %vm1768_vm8 = vmmov %vm1767_vm3  ;;  %vm1773_vm5 = vcmp.lt.s32.totalorder %v1403_v25, 113 }
 0x1f6   : > { %727 = vst [vmem:[#allocation3 + $0x30] sm:$0xf0] %v723_v43  ;;  %vm1772_vm12 = vmmov %vm1767_vm3 }
 0x1f7   : > { %728 = vst [vmem:[#allocation3 + $0x18] sm:$0xf0] %v724_v47  ;;  %989 = vmatpush.msk.msrb.mxu1 %vm1772_vm12, %v808_v61 }
 0x1f8   : > { %v690_v48 = vpop.permute.xlu1 %689  ;;  %990 = vmatmul.msk.f32.vlgmr.msrb.gmra.mxu1 %vm809_vm13, %v351_v63  ;;  %v660_v10 = vpop.permute.xlu2 %659 }
 0x1f9   : > { %v688_v49 = vpop.permute.xlu0 %687 }
 0x1fa   : > { %v691_v41 = vsel %vm1765_vm14, %v688_v49, %v690_v48  ;;  %v692_v46 = vsel %vm1766_vm0, %v690_v48, %v688_v49  ;;  %v748_v50 = vld [vmem:[#allocation3 + $0x28] sm:$0xf]  ;;  %vm1774_vm14 = vmmov %vm1773_vm5  ;;  %vm1780_vm0 = vcmp.lt.s32.totalorder %v1403_v25, 15 }
 0x1fb   : > { %v693_v17 = vsel %vm1450_vm10, %v691_v41, 0.0  ;;  %v694_v18 = vsel %vm1454_vm11, %v692_v46, 0.0  ;;  %983 = vmatpush.msk.msra.mxu2 %vm1767_vm3, %v748_v50  ;;  %v749_v51 = vld [vmem:[#allocation3 + $0x20] sm:$0xf]  ;;  %vm1770_vm10 = vmmov %vm1769_vm4 }
 0x1fc   : > { %v697_v53 = vrot.slane %v693_v17, 4  ;;  %v698_v54 = vrot.slane %v694_v18, 4  ;;  %985 = vmatpush.msk.msra.mxu3 %vm1768_vm8, %v749_v51  ;;  %vm1771_vm11 = vmmov %vm1767_vm3  ;;  %vm1782_vm8 = vnez %v1758_v57 }
 0x1fd   : > { %987 = vmatpush.msk.msrb.mxu0 %vm1771_vm11, %v807_v56  ;;  %vm1781_vm3 = vmmov %vm1780_vm0 }
 0x1fe   : > { %701 = vst [vmem:[#allocation3 + $0x38] sm:$0xf0] %v697_v53  ;;  %988 = vmatmul.msk.f32.vlgmr.msrb.gmra.mxu0 %vm809_vm13, %v351_v63 }
 0x1ff   : > { %702 = vst [vmem:[#allocation3 + $0x8] sm:$0xf0] %v698_v54 }
 0x200   : > { %v670_v55 = vpop.permute.xlu1 %669  ;;  %v636_v23 = vpop.permute.xlu2 %635 }
 0x201   : > { %v706_v62 = vpop.permute.xlu0 %705  ;;  %v673_v59 = vsel %vm1769_vm4, %v670_v55, %v672_v52  ;;  %v674_v60 = vsel %vm1770_vm10, %v672_v52, %v670_v55  ;;  %vm1783_vm4 = vnez %v1760_v58  ;;  %vm1784_vm10 = vnez %v1752_v40 }
 0x202   : > { %v707_v1 = vsel %vm1773_vm5, %v704_v33, %v706_v62  ;;  %v708_v2 = vsel %vm1774_vm14, %v706_v62, %v704_v33  ;;  %v675_v3 = vsel %vm1427_vm6, %v674_v60, 0.0  ;;  %v676_v6 = vsel %vm1431_vm7, %v673_v59, 0.0 }
 0x203   : > { %v709_v7 = vsel %vm1468_vm15, %v707_v1, 0.0  ;;  %v710_v39 = vsel %vm1472_vm1, %v708_v2, 0.0  ;;  %v679_v8 = vrot.slane %v675_v3, 4  ;;  %v680_v9 = vrot.slane %v676_v6, 4 }
 0x204   : > { %711 = vst [vmem:[#allocation3 + $0x30] sm:$0xf] %v709_v7  ;;  %vm1775_vm6 = vcmp.lt.s32.totalorder %v1403_v25, 16  ;;  %vm1777_vm1 = vnez %v1732_v30 }
 0x205   : > { %712 = vst [vmem:[#allocation3 + $0x18] sm:$0xf] %v710_v39  ;;  %vm1776_vm7 = vmmov %vm1775_vm6  ;;  %v744_v19 = vld [vmem:[#allocation3 + $0x38] sm:$0xff] }
 0x206   : > { %683 = vst [vmem:[#allocation3 + $0x10] sm:$0xf0] %v679_v8  ;;  %v745_v22 = vld [vmem:[#allocation3 + $0x8] sm:$0xff] }
 0x207   : > { %684 = vst [vmem:[#allocation3 + $0x40] sm:$0xf0] %v680_v9 }
 0x208   : > { %v646_v44 = vpop.permute.xlu1 %645 }
 0x209   : > { %v644_v11 = vpop.permute.xlu0 %643 }
 0x20a   : > { %v647_v45 = vsel %vm1775_vm6, %v644_v11, %v646_v44  ;;  %v648_v4 = vsel %vm1776_vm7, %v646_v44, %v644_v11 }
 0x20b   : > { %v649_v5 = vsel %vm1406_vm2, %v648_v4, 0.0  ;;  %v650_v12 = vsel %vm1777_vm1, %v647_v45, 0.0  ;;  %v746_v13 = vld [vmem:[#allocation3 + $0x30] sm:$0xff]  ;;  %vm1778_vm2 = vcmp.lt.s32.totalorder %v1403_v25, 17 }
 0x20c   : > { %v653_v14 = vrot.slane %v649_v5, 4  ;;  %v654_v15 = vrot.slane %v650_v12, 4  ;;  %777 = vmatpush.msra.mxu2 %v746_v13  ;;  %v747_v16 = vld [vmem:[#allocation3 + $0x18] sm:$0xff]  ;;  %vm1779_vm15 = vmmov %vm1778_vm2 }
 0x20d   : > { %797 = vmatpush.msra.mxu3 %v747_v16 }
 0x20e   : > { %657 = vst [vmem:[#allocation3 + $0x48] sm:$0xf0] %v653_v14  ;;  %778 = vmatpush.msra.mxu2 %v744_v19 }
 0x20f   : > { %658 = vst [vmem:[#allocation3] sm:$0xf0] %v654_v15  ;;  %798 = vmatpush.msra.mxu3 %v745_v22 }
 0x210   : > { %v634_v24 = vpop.permute.xlu1 %633 }
 0x211   : > { %v662_v21 = vpop.permute.xlu0 %661  ;;  %v637_v29 = vsel %vm1778_vm2, %v634_v24, %v636_v23  ;;  %v638_v30 = vsel %vm1779_vm15, %v636_v23, %v634_v24 }
 0x212   : > { %v663_v26 = vsel %vm1780_vm0, %v660_v10, %v662_v21  ;;  %v664_v27 = vsel %vm1781_vm3, %v662_v21, %v660_v10  ;;  %v639_v28 = vsel %vm1521_vm9, %v638_v30, 0.0  ;;  %v640_v33 = vsel %vm1784_vm10, %v637_v29, 0.0 }
 0x213   : > { %v665_v31 = vsel %vm1782_vm8, %v664_v27, 0.0  ;;  %v666_v32 = vsel %vm1783_vm4, %v663_v26, 0.0  ;;  %641 = vst [vmem:[#allocation3 + $0x48] sm:$0xf] %v639_v28  ;;  %vm1785_vm9 = vcmask 293888  }
 0x214   : > { %667 = vst [vmem:[#allocation3 + $0x10] sm:$0xf] %v665_v31  ;;  %vm1786_vm11 = vmmov %vm1785_vm9 }
 0x215   : > { %668 = vst [vmem:[#allocation3 + $0x40] sm:$0xf] %v666_v32 }
 0x216   : > { %642 = vst [vmem:[#allocation3] sm:$0xf] %v640_v33 }
 0x219   : > { %v754_v40 = vpop.permute.xlu0 %753 }
 0x21a   : > { %v740_v35 = vld [vmem:[#allocation3 + $0x48] sm:$0xff] }
 0x21b   : > { %v742_v25 = vld [vmem:[#allocation3 + $0x10] sm:$0xff] }
 0x21c   : > { %779 = vmatpush.msra.mxu2 %v742_v25  ;;  %v743_v34 = vld [vmem:[#allocation3 + $0x40] sm:$0xff] }
 0x21d   : > { %799 = vmatpush.msra.mxu3 %v743_v34  ;;  %v741_v57 = vld [vmem:[#allocation3] sm:$0xff] }
 0x21e   : > { %780 = vmatpush.msra.mxu2 %v740_v35 }
 0x21f   : > { %800 = vmatpush.msra.mxu3 %v741_v57  ;;  %984 = vmatmul.msk.f32.vlgmr.msra.gmra.mxu2 %vm1785_vm9, %v739_v38 }
 0x220   : > { %986 = vmatmul.msk.f32.vlgmr.msra.gmra.mxu3 %vm1786_vm11, %v739_v38 }
 0x275   : > { %v854_v42 = vpop.f32.mrf.mxu1 }
 0x27b   : > { %v834_v36 = vpop.f32.mrf.mxu0 }
 0x2a2   : > { %v782_v58 = vpop.f32.mrf.mxu2 }
 0x2a3   : > { %v783_v37 = vadd.f32 %v782_v58, %v754_v40  ;;  %v802_v20 = vpop.f32.mrf.mxu3 }
 0x2a4   : > { %v803_v43 = vadd.f32 %v802_v20, %v754_v40 }
 0x2a5   : > { %v835_v47 = vadd.f32 %v834_v36, %v783_v37 }
 0x2a6   : > { %v855_v48 = vadd.f32 %v854_v42, %v803_v43 }
 0x2a7   : > { %857 = vst [vmem:[%s342_s22] sm:$0xff] %v835_v47 }
 0x2a8   : > { %858 = vst [vmem:[%s342_s22 + $0x8] sm:$0xff] %v855_v48 }
 0x2a9   : > { %1196 = shalt.err (!%p1193_p8)
}
 0x2aa   : > { %1010 = dma.vmem_to_hbm [thread:$0]  (%p1336_p5), %s874_s23, 256, %s876_s17, %s860_s9  }
 0x2ab PF: > { %p1032_p9 = scmp.ge.s32.totalorder %s1239_s30, 2  ;;  %s887_s12 = sand.u32 1, %s1227_s27  }
 0x2ac   : > { %s888_s21 = scalar_lea.sflag [#allocation6], %s887_s12 }
 0x2ad   : > { %p1023_p10 = pnand %p1032_p9, %p1340_p6 }
 0x2af   : > { %p1024_p11 = pneg %p1023_p10 }
 0x2b1   : > { %1222 = dma.done.wait (%p1024_p11), %s888_s21, 256  }
 0x2b2   : > { %1224 = vsyncadd (%p1024_p11), %s888_s21, 4294967040  ;;  %p20_p12 = scmp.ge.s32.totalorder %s1323_s11, 4   ;;  %s1787_s27 = smov %s1231_s28 }
 0x2b3   : > { %s1788_s28 = smov %s1235_s29  ;;  %s1789_s29 = smov %s1334_s14 }
 0x2b4   : > { %s1790_s30 = smov %s1323_s11  ;;  %22 = sbr.rel (!%p20_p12) target bundleno = 5 (0x5), region = 100 }
 0x2b9   :  { %894 = vsyncpa [#allocation5], 1 }
 0x2ba   :  { %896 = vsyncpa [#allocation5 + $0x1], 1 }
 0x2bb   :  { %897 = vsyncpa [#allocation8], 1 }
 0x2bc   :  { %898 = vsyncpa [#allocation6], 1 }
 0x2bd   :  { %900 = vsyncpa [#allocation6 + $0x1], 1 }

</bundles_post_ra>
